<compile_context>
chip_gen: v7x
topology: tpu7x:2x2x1
jax: 0.10.0
libtpu: 0.0.40
codegen_flags: <defaults>
</compile_context>

<pallas_src>
import functools

import jax
import jax.numpy as jnp
from jax import lax
from jax.experimental import pallas as pl
from jax.experimental.pallas import tpu as pltpu


def _round_up(n, m):
    return (n + m - 1) // m * m


# ---------------------------------------------------------------------------
# Kernel 1: row-tiled matmul (QKV projection, bias-free)
# ---------------------------------------------------------------------------
def _matmul_kernel(x_ref, w_ref, o_ref):
    # Native-dtype operands on the MXU, f32 accumulation.
    o_ref[...] = jnp.dot(
        x_ref[...], w_ref[...], preferred_element_type=jnp.float32
    ).astype(o_ref.dtype)


def _row_tiled_matmul(x2, w, *, row_tile):
    rows, K = x2.shape
    N = w.shape[1]
    tile = _round_up(min(row_tile, _round_up(rows, 8)), 8)
    padded = _round_up(rows, tile)
    if padded != rows:
        x2 = jnp.pad(x2, ((0, padded - rows), (0, 0)))
    out = pl.pallas_call(
        _matmul_kernel,
        out_shape=jax.ShapeDtypeStruct((padded, N), x2.dtype),
        grid_spec=pltpu.PrefetchScalarGridSpec(
            num_scalar_prefetch=0,
            grid=(padded // tile,),
            in_specs=[
                pl.BlockSpec((tile, K), lambda i: (i, 0)),   # x row tile
                pl.BlockSpec((K, N), lambda i: (0, 0)),      # W resident in VMEM
            ],
            out_specs=pl.BlockSpec((tile, N), lambda i: (i, 0)),
        ),
        compiler_params=pltpu.CompilerParams(dimension_semantics=("parallel",)),
    )(x2, w)
    return out[:rows]


# ---------------------------------------------------------------------------
# Kernel 2: flash attention (online softmax in f32)
# ---------------------------------------------------------------------------
def _flash_attn_kernel(q_ref, k_ref, v_ref, o_ref, m_sc, l_sc, acc_sc, *,
                       scale, causal, block_q, block_k):
    ki = pl.program_id(2)

    @pl.when(ki == 0)
    def _():
        m_sc[...] = jnp.full_like(m_sc, -jnp.inf)
        l_sc[...] = jnp.zeros_like(l_sc)
        acc_sc[...] = jnp.zeros_like(acc_sc)

    # (1, tq, d) x (1, tk, d) -> (1, tq, tk); f32 accumulation on the MXU.
    s = jnp.einsum("bqd,bkd->bqk", q_ref[...], k_ref[...],
                   preferred_element_type=jnp.float32) * scale

    if causal:
        qi = pl.program_id(1)
        q_idx = qi * block_q + lax.broadcasted_iota(
            jnp.int32, (1, block_q, block_k), 1)
        k_idx = ki * block_k + lax.broadcasted_iota(
            jnp.int32, (1, block_q, block_k), 2)
        s = jnp.where(k_idx > q_idx, -1e30, s)

    m_prev = m_sc[...]
    m_new = jnp.maximum(m_prev, s.max(axis=-1, keepdims=True))
    alpha = jnp.exp(m_prev - m_new)
    p = jnp.exp(s - m_new)
    l_sc[...] = alpha * l_sc[...] + p.sum(axis=-1, keepdims=True)
    # attn is cast back to the value dtype (matches torch attn.type(sim.dtype)).
    acc_sc[...] = alpha * acc_sc[...] + jnp.einsum(
        "bqk,bkd->bqd", p.astype(v_ref.dtype), v_ref[...],
        preferred_element_type=jnp.float32)
    m_sc[...] = m_new

    @pl.when(ki == pl.num_programs(2) - 1)
    def _():
        o_ref[...] = (acc_sc[...] / l_sc[...]).astype(o_ref.dtype)


def _flash_attention(q, k, v, *, scale, causal, block_q=128, block_k=128):
    BH, S, d = q.shape
    bq = min(block_q, S)
    bk = min(block_k, S)
    # TODO(synk): ragged / non-divisible sequence lengths would need key masking.
    assert S % bq == 0 and S % bk == 0, "seq len must divide the q/kv block size"

    kernel = functools.partial(_flash_attn_kernel, scale=scale, causal=causal,
                               block_q=bq, block_k=bk)
    return pl.pallas_call(
        kernel,
        out_shape=jax.ShapeDtypeStruct((BH, S, d), q.dtype),
        grid_spec=pltpu.PrefetchScalarGridSpec(
            num_scalar_prefetch=0,
            grid=(BH, S // bq, S // bk),
            in_specs=[
                pl.BlockSpec((1, bq, d), lambda b, qi, ki: (b, qi, 0)),
                pl.BlockSpec((1, bk, d), lambda b, qi, ki: (b, ki, 0)),
                pl.BlockSpec((1, bk, d), lambda b, qi, ki: (b, ki, 0)),
            ],
            out_specs=pl.BlockSpec((1, bq, d), lambda b, qi, ki: (b, qi, 0)),
            scratch_shapes=[
                pltpu.VMEM((1, bq, 1), jnp.float32),   # running max m
                pltpu.VMEM((1, bq, 1), jnp.float32),   # running denom l
                pltpu.VMEM((1, bq, d), jnp.float32),   # f32 accumulator
            ],
        ),
        compiler_params=pltpu.CompilerParams(
            dimension_semantics=("parallel", "parallel", "arbitrary")),
    )(q, k, v)


# ---------------------------------------------------------------------------
# Kernel 3: fused to_out Linear (bias-free) + gain-only LayerNorm
# ---------------------------------------------------------------------------
def _matmul_layernorm_kernel(x_ref, w_ref, g_ref, o_ref, *, eps):
    y = jnp.dot(x_ref[...], w_ref[...], preferred_element_type=jnp.float32)
    mean = jnp.mean(y, axis=-1, keepdims=True)
    c = y - mean
    var = jnp.mean(c * c, axis=-1, keepdims=True)      # unbiased=False
    o_ref[...] = (c * lax.rsqrt(var + eps)
                  * g_ref[...].astype(jnp.float32)).astype(o_ref.dtype)


def _row_tiled_matmul_layernorm(x2, w, g, *, eps, row_tile, out_dtype):
    rows, K = x2.shape
    N = w.shape[1]
    tile = _round_up(min(row_tile, _round_up(rows, 8)), 8)
    padded = _round_up(rows, tile)
    if padded != rows:
        x2 = jnp.pad(x2, ((0, padded - rows), (0, 0)))
    kernel = functools.partial(_matmul_layernorm_kernel, eps=eps)
    out = pl.pallas_call(
        kernel,
        out_shape=jax.ShapeDtypeStruct((padded, N), out_dtype),
        grid_spec=pltpu.PrefetchScalarGridSpec(
            num_scalar_prefetch=0,
            grid=(padded // tile,),
            in_specs=[
                pl.BlockSpec((tile, K), lambda i: (i, 0)),
                pl.BlockSpec((K, N), lambda i: (0, 0)),      # W_out resident
                pl.BlockSpec((1, N), lambda i: (0, 0)),      # LayerNorm gain
            ],
            out_specs=pl.BlockSpec((tile, N), lambda i: (i, 0)),
        ),
        compiler_params=pltpu.CompilerParams(dimension_semantics=("parallel",)),
    )(x2, w, g.reshape(1, N))
    return out[:rows]


# ---------------------------------------------------------------------------
# Full Attention forward
# ---------------------------------------------------------------------------
def attention_forward(x, w_qkv, w_out, g, *, heads, dim_head,
                      causal=False, row_tile=256, block_q=128, block_k=128):
    """x: (B, S, dim); w_qkv: (dim, 3*inner); w_out: (inner, dim); g: (dim,)."""
    B, S, dim = x.shape
    inner = heads * dim_head
    scale = dim_head ** -0.5
    eps = 1e-5 if x.dtype == jnp.float32 else 1e-3

    # to_qkv (bias-free Linear)
    qkv = _row_tiled_matmul(x.reshape(B * S, dim), w_qkv, row_tile=row_tile)
    qkv = qkv.reshape(B, S, 3 * inner)
    q, k, v = jnp.split(qkv, 3, axis=-1)

    # rearrange 'b n (h d) -> (b h) n d'
    def to_heads(t):
        return t.reshape(B, S, heads, dim_head).transpose(0, 2, 1, 3).reshape(
            B * heads, S, dim_head)
    q, k, v = to_heads(q), to_heads(k), to_heads(v)

    # scaled dot-product attention (flash, f32 online softmax)
    # TODO(synk): key-padding `mask` argument and train-time dropout not implemented.
    o = _flash_attention(q, k, v, scale=scale, causal=causal,
                         block_q=block_q, block_k=block_k)

    # rearrange '(b h) n d -> (b n) (h d)'
    o = o.reshape(B, heads, S, dim_head).transpose(0, 2, 1, 3).reshape(B * S, inner)

    # to_out = Linear(inner, dim, bias=False) + gain-only LayerNorm, fused
    y = _row_tiled_matmul_layernorm(o, w_out, g, eps=eps, row_tile=row_tile,
                                    out_dtype=x.dtype)
    return y.reshape(B, S, dim)


# ---------------------------------------------------------------------------
# Pure-JAX reference (matches the PyTorch module semantics)
# ---------------------------------------------------------------------------
def attention_ref(x, w_qkv, w_out, g, *, heads, dim_head, causal=False):
    B, S, dim = x.shape
    inner = heads * dim_head
    scale = dim_head ** -0.5
    eps = 1e-5 if x.dtype == jnp.float32 else 1e-3

    qkv = x @ w_qkv
    q, k, v = jnp.split(qkv, 3, axis=-1)

    def to_heads(t):
        return t.reshape(B, S, heads, dim_head).transpose(0, 2, 1, 3)
    q, k, v = to_heads(q), to_heads(k), to_heads(v)

    sim = jnp.einsum("bhid,bhjd->bhij", q, k) * scale
    if causal:
        i = jnp.arange(S)[:, None]
        j = jnp.arange(S)[None, :]
        sim = jnp.where(j > i, -1e30, sim)
    attn = jax.nn.softmax(sim.astype(jnp.float32), axis=-1).astype(sim.dtype)
    o = jnp.einsum("bhij,bhjd->bhid", attn, v)
    o = o.transpose(0, 2, 1, 3).reshape(B, S, inner)

    y = (o @ w_out).astype(jnp.float32)
    mean = jnp.mean(y, axis=-1, keepdims=True)
    var = jnp.mean((y - mean) ** 2, axis=-1, keepdims=True)
    return ((y - mean) * lax.rsqrt(var + eps)
            * g.astype(jnp.float32)).astype(x.dtype)


if __name__ == "__main__":
    key = jax.random.PRNGKey(0)
    B, S, dim = 2, 8, 128          # lane-dense model dim (multiple of 128)
    heads, dim_head = 2, 64        # inner_dim = 128
    inner = heads * dim_head

    kx, kq, ko = jax.random.split(key, 3)
    x = jax.random.normal(kx, (B, S, dim), dtype=jnp.float32)
    # Weights stored as (in, out) layout = torch Linear weight transposed.
    w_qkv = jax.random.normal(kq, (dim, 3 * inner), dtype=jnp.float32) * (dim ** -0.5)
    w_out = jax.random.normal(ko, (inner, dim), dtype=jnp.float32) * (inner ** -0.5)
    g = jnp.ones((dim,), dtype=jnp.float32)   # LayerNorm gain

    out = attention_forward(x, w_qkv, w_out, g, heads=heads, dim_head=dim_head)
    out = jax.block_until_ready(out)

    ref = attention_ref(x, w_qkv, w_out, g, heads=heads, dim_head=dim_head)
    assert out.shape == (B, S, dim)
    assert jnp.allclose(out, ref, atol=1e-2, rtol=1e-2), (
        "mismatch vs reference: max abs diff = "
        f"{float(jnp.max(jnp.abs(out - ref)))}")

    print("KERNEL_OK")
</pallas_src>

<mosaic_0001>
module attributes {stable_mosaic.version = 11 : i64} {
  func.func @_matmul_kernel(%arg0: i32, %arg1: memref<16x128xf32, #tpu.memory_space<vmem>>, %arg2: memref<128x384xf32, #tpu.memory_space<vmem>>, %arg3: memref<16x384xf32, #tpu.memory_space<vmem>>) attributes {dimension_semantics = [#tpu.dimension_semantics<parallel>], iteration_bounds = array<i64: 1>, scalar_prefetch = 0 : i64, scratch_operands = 0 : i64, tpu.core_type = #tpu.core_type<tc>, window_params = [{transform_indices = @transform_0, window_bounds = array<i64: 16, 128>}, {pipeline_mode = #tpu.pipeline_mode<synchronous>, transform_indices = @transform_1, window_bounds = array<i64: 128, 384>}, {transform_indices = @transform_2, window_bounds = array<i64: 16, 384>}]} {
    %c0 = arith.constant 0 : index
    %c0_0 = arith.constant 0 : index
    %0 = vector.load %arg1[%c0, %c0_0] : memref<16x128xf32, #tpu.memory_space<vmem>>, vector<16x128xf32>
    %c0_1 = arith.constant 0 : index
    %c0_2 = arith.constant 0 : index
    %1 = vector.load %arg2[%c0_1, %c0_2] : memref<128x384xf32, #tpu.memory_space<vmem>>, vector<128x384xf32>
    %cst = arith.constant dense<0.000000e+00> : vector<16x384xf32>
    %2 = tpu.matmul %0, %1, %cst {dimension_numbers = #tpu.dot_dimension_numbers<[1], [0], [0], [1], [0, 0, 1, 1], [], []>} : vector<16x128xf32>, vector<128x384xf32>, vector<16x384xf32> -> vector<16x384xf32>
    %c0_3 = arith.constant 0 : index
    %c0_4 = arith.constant 0 : index
    %3 = vector.load %arg3[%c0_3, %c0_4] : memref<16x384xf32, #tpu.memory_space<vmem>>, vector<16x384xf32>
    tpu.vector_store %arg3[%c0_3, %c0_4], %2 {strides = array<i32>} : memref<16x384xf32, #tpu.memory_space<vmem>>, vector<16x384xf32>,
    return
  }
  func.func @transform_0(%arg0: i32) -> (i32, i32) {
    %c0_i32 = arith.constant 0 : i32
    %c0_i32_0 = arith.constant 0 : i32
    return %arg0, %c0_i32 : i32, i32
  }
  func.func @transform_1(%arg0: i32) -> (i32, i32) {
    %c0_i32 = arith.constant 0 : i32
    %c0_i32_0 = arith.constant 0 : i32
    %c0_i32_1 = arith.constant 0 : i32
    return %c0_i32, %c0_i32_0 : i32, i32
  }
  func.func @transform_2(%arg0: i32) -> (i32, i32) {
    %c0_i32 = arith.constant 0 : i32
    %c0_i32_0 = arith.constant 0 : i32
    return %arg0, %c0_i32 : i32, i32
  }
}

</mosaic_0001>

<bundles_post_ra>
// kernel: tpu_custom_call.1
= control target key start
LH: loop header
LB: loop body
LE: loop exit
PB: predicated region body
PF: predicated region fallthrough
CT: control target
= control target key end

     0   :  { %7 = vsyncpa [#allocation3], 0  ;;  %s530_s0 = inlined_call_operand.hbm [shape: f32[16,128], index: 0, kind: input, shape index: {}]   ;;  %s531_s1 = inlined_call_operand.hbm [shape: f32[128,384], index: 1, kind: input, shape index: {}]   ;;  %s532_s2 = inlined_call_operand.hbm [shape: f32[16,384], index: 2, kind: output, shape index: {}]  }
   0x1   :  { %8 = vsyncpa [#allocation6], 0 }
   0x2   :  { %9 = vsyncpa [#allocation4], 0  ;;  %s463_s9 = smov [#allocation2]   ;;  %s391_s13 = scalar_lea.hbm %s530_s0, 256 }
   0x3   :  { %s15_s10 = sshll.u32 %s463_s9, 4  ;;  %p392_p0 = scmp.ne.s32.totalorder %s530_s0, %s391_s13  ;;  %s16_s10 = int_to_ptr.vmem [resolvable:$true] %s15_s10 }
   0x4   :  { %p395_p1 = scmp.lt.u32.totalorder %s391_s13, %s530_s0 }
   0x6   :  { %p397_p2 = pnand %p395_p1, %p392_p0 }
   0x8   :  { %400 = shalt.err (!%p397_p2)
}
   0x9   :  { %s401_s18 = scalar_lea.vmem %s16_s10, 256  ;;  %p406_p4 = scmp.lt.s32.totalorder %s16_s10, %s16_s10 }
   0xa   :  { %p402_p3 = scmp.ne.s32.totalorder %s16_s10, %s401_s18  ;;  %p407_p5 = scmp.lt.s32.totalorder %s401_s18, %s401_s18 }
   0xc   :  { %p408_p6 = por %p407_p5, %p406_p4 }
   0xe   :  { %p409_p7 = pnand %p408_p6, %p402_p3 }
  0x10   :  { %412 = shalt.err (!%p409_p7)
}
  0x11   :  { %s464_s19 = smov 128   ;;  %s465_s20 = smov 8  }
  0x12   :  { %21 = dma.hbm_to_vmem [thread:$0]  %s530_s0, 256, %s16_s10, [#allocation3], %s464_s19, %s464_s19, %s465_s20  }
  0x13   :  { %s466_s23 = smov [#allocation5]   ;;  %s413_s27 = scalar_lea.hbm %s531_s1, 6144 }
  0x14   :  { %s27_s24 = sshll.u32 %s466_s23, 4  ;;  %p414_p8 = scmp.ne.s32.totalorder %s531_s1, %s413_s27  ;;  %s28_s24 = int_to_ptr.vmem [resolvable:$true] %s27_s24 }
  0x15   :  { %p417_p9 = scmp.lt.u32.totalorder %s413_s27, %s531_s1 }
  0x17   :  { %p419_p10 = pnand %p417_p9, %p414_p8 }
  0x19   :  { %422 = shalt.err (!%p419_p10)
}
  0x1a   :  { %s423_s4 = scalar_lea.vmem %s28_s24, 6144  ;;  %p428_p12 = scmp.lt.s32.totalorder %s28_s24, %s28_s24 }
  0x1b   :  { %p424_p11 = scmp.ne.s32.totalorder %s28_s24, %s423_s4  ;;  %p429_p13 = scmp.lt.s32.totalorder %s423_s4, %s423_s4 }
  0x1d   :  { %p430_p0 = por %p429_p13, %p428_p12 }
  0x1f   :  { %p431_p1 = pnand %p430_p0, %p424_p11 }
  0x21   :  { %434 = shalt.err (!%p431_p1)
}
  0x22   :  { %s467_s0 = smov 384   ;;  %s468_s5 = smov 24  }
  0x23   :  { %33 = dma.hbm_to_vmem [thread:$0]  %s531_s1, 6144, %s28_s24, [#allocation6], %s467_s0, %s467_s0, %s468_s5  }
  0x24   :  { %457 = dma.done.wait [#allocation3], 256  }
  0x25   :  { %458 = vsyncadd [#allocation3], 4294967040 }
  0x26   :  { %459 = dma.done.wait [#allocation6], 6144  }
  0x27   :  { %460 = vsyncadd [#allocation6], 4294961152  ;;  %v469_v0 = vmov 0.0   ;;  %v43_v1 = vld [vmem:[#allocation5 + $0x8] sm:$0xff]  ;;  %v46_v2 = vld [vmem:[#allocation5 + $0x20] sm:$0xff]  ;;  %s470_s1 = smov [#allocation7]  }
  0x28   :  { %154 = vmatprep.mubr.f32.mxu0 %v469_v0  ;;  %v42_v3 = vld [vmem:[#allocation5] sm:$0xff]  ;;  %v319_v4 = vpack.c.bf16 %v46_v2, %v43_v1  ;;  %v45_v5 = vld [vmem:[#allocation5 + $0x18] sm:$0xff]  ;;  %v44_v6 = vld [vmem:[#allocation5 + $0x10] sm:$0xff]  ;;  %s253_s8 = sshll.u32 %s470_s1, 4  ;;  %s254_s8 = int_to_ptr.vmem [resolvable:$true] %s253_s8 }
  0x29   :  { %v47_v7 = vld [vmem:[#allocation5 + $0x28] sm:$0xff]  ;;  %v321_v8 = vpack.c.bf16 %v45_v5, %v42_v3  ;;  %v49_v10 = vld [vmem:[#allocation5 + $0x38] sm:$0xff]  ;;  %v52_v11 = vld [vmem:[#allocation5 + $0x50] sm:$0xff]  ;;  %s435_s9 = scalar_lea.vmem %s254_s8, 768  ;;  %p440_p3 = scmp.lt.s32.totalorder %s254_s8, %s254_s8 }
  0x2a   :  { %v351_v9 = vpack.c.bf16 %v47_v7, %v44_v6  ;;  %v48_v12 = vld [vmem:[#allocation5 + $0x30] sm:$0xff]  ;;  %320 = vmatprep.subr.bf16.mxu0 %v319_v4  ;;  %v323_v13 = vpack.c.bf16 %v52_v11, %v49_v10  ;;  %v51_v14 = vld [vmem:[#allocation5 + $0x48] sm:$0xff]  ;;  %v50_v15 = vld [vmem:[#allocation5 + $0x40] sm:$0xff]  ;;  %p436_p2 = scmp.ne.s32.totalorder %s254_s8, %s435_s9  ;;  %p441_p4 = scmp.lt.s32.totalorder %s435_s9, %s435_s9 }
  0x2b   :  { %v53_v16 = vld [vmem:[#allocation5 + $0x58] sm:$0xff]  ;;  %322 = vmatpush1.bf16.msra.mxu0 %v321_v8  ;;  %v325_v17 = vpack.c.bf16 %v51_v14, %v48_v12  ;;  %v55_v19 = vld [vmem:[#allocation5 + $0x68] sm:$0xff]  ;;  %v58_v20 = vld [vmem:[#allocation5 + $0x80] sm:$0xff] }
  0x2c   :  { %352 = vmatprep.subr.bf16.mxu1 %v351_v9  ;;  %v355_v18 = vpack.c.bf16 %v53_v16, %v50_v15  ;;  %v54_v21 = vld [vmem:[#allocation5 + $0x60] sm:$0xff]  ;;  %324 = vmatprep.subr.bf16.mxu0 %v323_v13  ;;  %v327_v22 = vpack.c.bf16 %v58_v20, %v55_v19  ;;  %v57_v23 = vld [vmem:[#allocation5 + $0x78] sm:$0xff]  ;;  %v56_v24 = vld [vmem:[#allocation5 + $0x70] sm:$0xff]  ;;  %p442_p5 = por %p441_p4, %p440_p3 }
  0x2d   :  { %354 = vmatpush3.bf16.msra.mxu1 %v351_v9  ;;  %v59_v25 = vld [vmem:[#allocation5 + $0x88] sm:$0xff]  ;;  %v61_v27 = vld [vmem:[#allocation5 + $0x98] sm:$0xff]  ;;  %v64_v28 = vld [vmem:[#allocation5 + $0xb0] sm:$0xff]  ;;  %v329_v31 = vpack.c.bf16 %v57_v23, %v54_v21 }
  0x2e   :  { %356 = vmatprep.subr.bf16.mxu1 %v355_v18  ;;  %v359_v26 = vpack.c.bf16 %v59_v25, %v56_v24  ;;  %v62_v29 = vld [vmem:[#allocation5 + $0xa0] sm:$0xff]  ;;  %v65_v30 = vld [vmem:[#allocation5 + $0xb8] sm:$0xff]  ;;  %v331_v32 = vpack.c.bf16 %v64_v28, %v61_v27  ;;  %v60_v33 = vld [vmem:[#allocation5 + $0x90] sm:$0xff]  ;;  %p443_p6 = pnand %p442_p5, %p436_p2 }
  0x2f   :  { %326 = vmatpush1.bf16.msra.mxu0 %v325_v17  ;;  %v63_v34 = vld [vmem:[#allocation5 + $0xa8] sm:$0xff]  ;;  %v363_v35 = vpack.c.bf16 %v65_v30, %v62_v29  ;;  %v70_v37 = vld [vmem:[#allocation5 + $0xe0] sm:$0xff]  ;;  %v68_v38 = vld [vmem:[#allocation5 + $0xd0] sm:$0xff] }
  0x30   :  { %328 = vmatprep.subr.bf16.mxu0 %v327_v22  ;;  %v67_v36 = vld [vmem:[#allocation5 + $0xc8] sm:$0xff]  ;;  %v333_v40 = vpack.c.bf16 %v63_v34, %v60_v33  ;;  %v66_v42 = vld [vmem:[#allocation5 + $0xc0] sm:$0xff]  ;;  %v69_v43 = vld [vmem:[#allocation5 + $0xd8] sm:$0xff] }
  0x31   :  { %358 = vmatpush3.bf16.msra.mxu1 %v355_v18  ;;  %v71_v39 = vld [vmem:[#allocation5 + $0xe8] sm:$0xff]  ;;  %v335_v41 = vpack.c.bf16 %v70_v37, %v67_v36  ;;  %v73_v45 = vld [vmem:[#allocation5 + $0xf8] sm:$0xff]  ;;  %v76_v46 = vld [vmem:[#allocation5 + $0x110] sm:$0xff]  ;;  %v337_v49 = vpack.c.bf16 %v69_v43, %v66_v42 }
  0x32   :  { %360 = vmatprep.subr.bf16.mxu1 %v359_v26  ;;  %v367_v44 = vpack.c.bf16 %v71_v39, %v68_v38  ;;  %v74_v47 = vld [vmem:[#allocation5 + $0x100] sm:$0xff]  ;;  %v77_v48 = vld [vmem:[#allocation5 + $0x118] sm:$0xff]  ;;  %v339_v50 = vpack.c.bf16 %v76_v46, %v73_v45  ;;  %v72_v51 = vld [vmem:[#allocation5 + $0xf0] sm:$0xff] }
  0x33   :  { %330 = vmatpush1.bf16.msra.mxu0 %v329_v31  ;;  %v75_v52 = vld [vmem:[#allocation5 + $0x108] sm:$0xff]  ;;  %v40_v53 = vld [vmem:[#allocation2] sm:$0xff]  ;;  %v371_v54 = vpack.c.bf16 %v77_v48, %v74_v47  ;;  %v82_v56 = vld [vmem:[#allocation5 + $0x140] sm:$0xff] }
  0x34   :  { %332 = vmatprep.subr.bf16.mxu0 %v331_v32  ;;  %v79_v55 = vld [vmem:[#allocation5 + $0x128] sm:$0xff]  ;;  %316 = vmatprep.mubr.f32.mxu1 %v40_v53  ;;  %v80_v57 = vld [vmem:[#allocation5 + $0x130] sm:$0xff]  ;;  %v341_v59 = vpack.c.bf16 %v75_v52, %v72_v51  ;;  %v78_v61 = vld [vmem:[#allocation5 + $0x120] sm:$0xff] }
  0x35   :  { %362 = vmatpush3.bf16.msra.mxu1 %v359_v26  ;;  %v83_v58 = vld [vmem:[#allocation5 + $0x148] sm:$0xff]  ;;  %v343_v60 = vpack.c.bf16 %v82_v56, %v79_v55  ;;  %v81_v62 = vld [vmem:[#allocation5 + $0x138] sm:$0xff]  ;;  %v88_v2 = vld [vmem:[#allocation5 + $0x170] sm:$0xff] }
  0x36   :  { %364 = vmatprep.subr.bf16.mxu1 %v363_v35  ;;  %v375_v63 = vpack.c.bf16 %v83_v58, %v80_v57  ;;  %v85_v1 = vld [vmem:[#allocation5 + $0x158] sm:$0xff]  ;;  %v86_v3 = vld [vmem:[#allocation5 + $0x160] sm:$0xff]  ;;  %v345_v5 = vpack.c.bf16 %v81_v62, %v78_v61  ;;  %v84_v7 = vld [vmem:[#allocation5 + $0x150] sm:$0xff] }
  0x37   :  { %334 = vmatpush1.bf16.msra.mxu0 %v333_v40  ;;  %v89_v4 = vld [vmem:[#allocation5 + $0x178] sm:$0xff]  ;;  %v347_v6 = vpack.c.bf16 %v88_v2, %v85_v1  ;;  %v87_v8 = vld [vmem:[#allocation5 + $0x168] sm:$0xff] }
  0x38   :  { %336 = vmatprep.subr.bf16.mxu0 %v335_v41  ;;  %v379_v9 = vpack.c.bf16 %v89_v4, %v86_v3  ;;  %v349_v10 = vpack.c.bf16 %v87_v8, %v84_v7  ;;  %v41_v11 = vld [vmem:[#allocation2 + $0x8] sm:$0xff] }
  0x39   :  { %366 = vmatpush3.bf16.msra.mxu1 %v363_v35 }
  0x3a   :  { %368 = vmatprep.subr.bf16.mxu1 %v367_v44 }
  0x3b   :  { %338 = vmatpush1.bf16.msra.mxu0 %v337_v49 }
  0x3c   :  { %340 = vmatprep.subr.bf16.mxu0 %v339_v50 }
  0x3d   :  { %370 = vmatpush3.bf16.msra.mxu1 %v367_v44 }
  0x3e   :  { %372 = vmatprep.subr.bf16.mxu1 %v371_v54 }
  0x3f   :  { %342 = vmatpush1.bf16.msra.mxu0 %v341_v59 }
  0x40   :  { %344 = vmatprep.subr.bf16.mxu0 %v343_v60 }
  0x41   :  { %374 = vmatpush3.bf16.msra.mxu1 %v371_v54 }
  0x42   :  { %376 = vmatprep.subr.bf16.mxu1 %v375_v63 }
  0x43   :  { %346 = vmatpush1.bf16.msra.mxu0 %v345_v5 }
  0x44   :  { %348 = vmatprep.subr.bf16.mxu0 %v347_v6 }
  0x45   :  { %378 = vmatpush3.bf16.msra.mxu1 %v375_v63 }
  0x46   :  { %380 = vmatprep.subr.bf16.mxu1 %v379_v9 }
  0x47   :  { %350 = vmatpush1.bf16.msra.mxu0 %v349_v10 }
  0x49   :  { %382 = vmatpush3.bf16.msra.mxu1 %v379_v9 }
  0x4a   :  { %155 = vmatmul.mubr.f32.vlgmr.msra.gmra.mrb[0].mxu0 %v40_v53 }
  0x4b   :  { %160 = vmatprep.mubr.f32.mxu0 %v469_v0 }
  0x4c   :  { %317 = vmatmul.mubr.f32.vlgmr.msra.gmra.mrb[0].mxu1 %v41_v11 }
  0x4e   :  { %161 = vmatmul.mubr.f32.gmra.mrb[2].mxu0 %v41_v11 }
 0x11d   :  { %v156_v12 = vpop.f32.mrb[0].mxu0 }
 0x11e   :  { %242 = vst [vmem:[#allocation7] sm:$0xff] %v156_v12  ;;  %v158_v13 = vpop.f32.mrb[1].mxu0 }
 0x11f   :  { %v318_v14 = vpop.f32.mrb[0].mxu1  ;;  %243 = vst [vmem:[#allocation7 + $0x8] sm:$0xff] %v158_v13 }
 0x120   :  { %247 = vst [vmem:[#allocation7 + $0x28] sm:$0xff] %v318_v14  ;;  %v233_v15 = vpop.f32.mrb[1].mxu1 }
 0x121   :  { %244 = vst [vmem:[#allocation7 + $0x10] sm:$0xff] %v233_v15  ;;  %v162_v16 = vpop.f32.mrb[2].mxu0 }
 0x122   :  { %245 = vst [vmem:[#allocation7 + $0x18] sm:$0xff] %v162_v16  ;;  %v164_v17 = vpop.f32.mrb[3].mxu0 }
 0x123   :  { %246 = vst [vmem:[#allocation7 + $0x20] sm:$0xff] %v164_v17 }
 0x124   :  { %446 = shalt.err (!%p443_p6)
}
 0x125   :  { %s447_s12 = scalar_lea.hbm %s532_s2, 768 }
 0x126   :  { %p448_p7 = scmp.ne.s32.totalorder %s532_s2, %s447_s12  ;;  %p451_p8 = scmp.lt.u32.totalorder %s447_s12, %s532_s2 }
 0x128   :  { %p453_p9 = pnand %p451_p8, %p448_p7 }
 0x12a   :  { %456 = shalt.err (!%p453_p9)
}
 0x12b   :  { %259 = dma.vmem_to_hbm [thread:$0]  %s254_s8, 768, %s532_s2, [#allocation4], %s467_s0, %s467_s0, %s468_s5  }
 0x12c   :  { %461 = dma.done.wait [#allocation4], 768  }
 0x12d   :  { %462 = vsyncadd [#allocation4], 4294966528 }
 0x12e   :  { %263 = vsyncpa [#allocation3], 1 }
 0x12f   :  { %264 = vsyncpa [#allocation6], 1 }
 0x130   :  { %265 = vsyncpa [#allocation4], 1 }

</bundles_post_ra>
